<compile_context>
chip_gen: v7x
topology: tpu7x:2x2x1
jax: 0.10.0
libtpu: 0.0.40
codegen_flags: <defaults>
</compile_context>

<pallas_src>
import functools

import jax
import jax.numpy as jnp
from jax.experimental import pallas as pl
from jax.experimental.pallas import tpu as pltpu


# --------------------------------------------------------------------------
# tiling / device helpers
# --------------------------------------------------------------------------
def _pick_tile(dim, align, max_tile):
    """Largest multiple of `align` that divides `dim` and is <= max_tile.
    Falls back to the full dimension (always a legal block extent)."""
    if dim <= align or dim % align != 0:
        return dim
    best = align
    t = align
    cap = min(dim, max_tile)
    while t <= cap:
        if dim % t == 0:
            best = t
        t += align
    return best


def _sublane_align(itemsize):
    # native sublane tiles: (8,128) f32, (16,128) bf16, (32,128) int8/fp8
    return {4: 8, 2: 16, 1: 32}.get(itemsize, 8)


@functools.lru_cache(maxsize=1)
def _device_config():
    cap = None
    try:
        info = pltpu.get_tpu_info()
        for attr in ("vmem_capacity_bytes", "vmem_size_bytes", "vmem_bytes"):
            v = getattr(info, attr, None)
            if v:
                cap = int(v)
                break
    except Exception:
        cap = None
    if cap is None:
        cap = 64 * 1024 * 1024              # conservative fallback (v7x per-TC)
    if cap >= 100 * 1024 * 1024:            # v5e / v6e: 128 MiB VMEM
        return dict(vmem_cap=cap,
                    max_block_bytes=8 * 1024 * 1024,
                    vmem_limit=96 * 1024 * 1024,
                    hw_cap=8192)
    # v7x: 64 MiB per TensorCore -> smaller blocks, lower scoped limit
    return dict(vmem_cap=cap,
                max_block_bytes=5 * 1024 * 1024,
                vmem_limit=48 * 1024 * 1024,
                hw_cap=4096)


def _vmem_limit(cfg, estimate_bytes):
    return int(min(cfg["vmem_cap"] * 9 // 10,
                   max(cfg["vmem_limit"], estimate_bytes)))


def _choose_tiles(C, HW, itemsize, align, cfg):
    """Tiles for the two-pass (streamed) path."""
    hw_t = _pick_tile(HW, 128, cfg["hw_cap"])
    # TODO(synk): when HW is huge and not a multiple of 128 this falls back to
    # a full-HW block; padding/masking HW to 128 would re-enable splitting.
    max_ct = max(align, cfg["max_block_bytes"] // max(1, hw_t * itemsize))
    if C >= 2 * align:
        max_ct = min(max_ct, max(align, C // 2))   # keep >=2 C-blocks (v7x 2-TC)
    c_t = _pick_tile(C, align, max_ct)
    return c_t, hw_t


def _fused_channel_tile(N, C, HW, itemsize, align, cfg):
    """Channel tile for the fused single-pass path, or None if it won't fit.
    Per-channel VMEM need ~ 2x in + 2x out (io dtype) + ~4 f32 temporaries."""
    per_c = N * HW * (4 * itemsize + 4 * 4)
    budget = cfg["vmem_limit"]
    max_ct = budget // max(1, per_c)
    if max_ct <= 0:
        return None
    if C <= max_ct:
        # Whole channel range fits; still split in two when cheap so the grid
        # has >=2 steps (pipelining + v7x two-core sharding).
        if C % (2 * align) == 0:
            return C // 2
        return C
    if C % align != 0 or max_ct < align:
        return None
    cap = min(max_ct, C // 2 if C >= 2 * align else C)
    return _pick_tile(C, align, cap)


# --------------------------------------------------------------------------
# fused single-pass kernel (x resident in VMEM: stats + normalize + act)
# --------------------------------------------------------------------------
def _make_fused_kernel(total_count, eps, slope):
    inv_total = 1.0 / float(total_count)
    eps = float(eps)
    slope = float(slope)

    def kernel(x_ref, w_ref, b_ref, y_ref, mv_ref):
        x = x_ref[...].astype(jnp.float32)                       # (N, Ct, HW)
        s = jnp.sum(jnp.sum(x, axis=2, keepdims=True), axis=0, keepdims=True)
        sq = jnp.sum(jnp.sum(x * x, axis=2, keepdims=True), axis=0,
                     keepdims=True)
        mean = s * inv_total                                     # (1, Ct, 1)
        var = jnp.maximum(sq * inv_total - mean * mean, 0.0)
        inv_std = jax.lax.rsqrt(var + eps)
        w = w_ref[...]                                           # (Ct, 1)
        b = b_ref[...]
        scale = w.reshape(1, w.shape[0], 1) * inv_std
        shift = b.reshape(1, b.shape[0], 1) - mean * scale
        y = x * scale + shift
        y_ref[...] = jnp.maximum(y, y * slope).astype(y_ref.dtype)
        mv_ref[:, 0:1] = mean[0]                                 # (Ct, 1)
        mv_ref[:, 1:2] = var[0]

    return kernel


# --------------------------------------------------------------------------
# pass 1: per-channel batch statistics + folded scale/offset (streamed)
# --------------------------------------------------------------------------
def _make_stats_kernel(total_count, eps):
    inv_total = 1.0 / float(total_count)
    eps = float(eps)

    def kernel(x_ref, shift_ref, w_ref, b_ref, ss_ref, mv_ref, acc_s, acc_sq):
        n_id = pl.program_id(1)
        l_id = pl.program_id(2)
        is_first = (n_id == 0) & (l_id == 0)
        is_last = ((n_id == pl.num_programs(1) - 1) &
                   (l_id == pl.num_programs(2) - 1))

        @pl.when(is_first)
        def _():
            acc_s[...] = jnp.zeros_like(acc_s)
            acc_sq[...] = jnp.zeros_like(acc_sq)

        # Single sweep of the tile: sums of d = (x - shift) and d*d, where
        # `shift` is the per-channel running mean — a free, close estimate of
        # the batch mean that keeps E[d^2] - E[d]^2 well conditioned.
        d = x_ref[...].astype(jnp.float32) - shift_ref[...]      # (Ct, HWt)
        acc_s[...] += jnp.sum(d, axis=1, keepdims=True)
        acc_sq[...] += jnp.sum(d * d, axis=1, keepdims=True)

        @pl.when(is_last)
        def _():
            dm = acc_s[...] * inv_total
            mean = dm + shift_ref[...]
            var = jnp.maximum(acc_sq[...] * inv_total - dm * dm, 0.0)
            inv_std = jax.lax.rsqrt(var + eps)
            scale = w_ref[...] * inv_std
            offset = b_ref[...] - mean * scale
            ss_ref[:, 0:1] = scale
            ss_ref[:, 1:2] = offset
            mv_ref[:, 0:1] = mean
            mv_ref[:, 1:2] = var

    return kernel


# --------------------------------------------------------------------------
# pass 2: normalize + affine + leaky_relu (fully parallel, memory bound)
# --------------------------------------------------------------------------
def _make_norm_kernel(slope):
    slope = float(slope)

    def kernel(x_ref, ss_ref, y_ref):
        x = x_ref[...].astype(jnp.float32)                       # (Ct, HWt)
        y = x * ss_ref[:, 0:1] + ss_ref[:, 1:2]
        y_ref[...] = jnp.maximum(y, y * slope).astype(y_ref.dtype)

    return kernel


# --------------------------------------------------------------------------
# wrapper
# --------------------------------------------------------------------------
def abn_forward(x_nchw, weight, bias, running_mean, running_var,
                eps=1e-5, momentum=0.1, slope=0.01, allow_fused=True):
    """Training-mode ABN forward.  Returns (y, new_running_mean, new_running_var)."""
    N, C, H, W = x_nchw.shape
    HW = H * W
    total = N * HW

    x3 = x_nchw.reshape(N, C, HW)                 # free view, no transpose
    itemsize = jnp.dtype(x_nchw.dtype).itemsize
    align = _sublane_align(itemsize)
    cfg = _device_config()

    w2 = weight.astype(jnp.float32).reshape(C, 1)
    b2 = bias.astype(jnp.float32).reshape(C, 1)
    rm2 = running_mean.astype(jnp.float32).reshape(C, 1)

    c_fused = (_fused_channel_tile(N, C, HW, itemsize, align, cfg)
               if allow_fused else None)

    if c_fused is not None:
        # ---- fused single pass: x read from HBM exactly once ----
        n_cb = C // c_fused
        block_io = N * c_fused * HW * itemsize
        block_f32 = N * c_fused * HW * 4
        vmem_limit = _vmem_limit(cfg, 4 * block_io + 4 * block_f32)
        y3, mv = pl.pallas_call(
            _make_fused_kernel(total, eps, slope),
            out_shape=(
                jax.ShapeDtypeStruct((N, C, HW), x_nchw.dtype),
                jax.ShapeDtypeStruct((C, 2), jnp.float32),
            ),
            grid=(n_cb,),
            in_specs=[
                pl.BlockSpec((N, c_fused, HW), lambda c: (0, c, 0)),
                pl.BlockSpec((c_fused, 1), lambda c: (c, 0)),
                pl.BlockSpec((c_fused, 1), lambda c: (c, 0)),
            ],
            out_specs=(
                pl.BlockSpec((N, c_fused, HW), lambda c: (0, c, 0)),
                pl.BlockSpec((c_fused, 2), lambda c: (c, 0)),
            ),
            compiler_params=pltpu.CompilerParams(
                dimension_semantics=("parallel",),
                vmem_limit_bytes=vmem_limit,
            ),
        )(x3, w2, b2)
    else:
        # ---- two streamed passes ----
        c_t, hw_t = _choose_tiles(C, HW, itemsize, align, cfg)
        n_cb = C // c_t
        n_hwb = HW // hw_t
        block_io = c_t * hw_t * itemsize
        block_f32 = c_t * hw_t * 4

        # pass 1: batch stats + folded per-channel scale/offset
        vmem1 = _vmem_limit(cfg, 2 * block_io + 3 * block_f32)
        ss, mv = pl.pallas_call(
            _make_stats_kernel(total, eps),
            out_shape=(
                jax.ShapeDtypeStruct((C, 2), jnp.float32),
                jax.ShapeDtypeStruct((C, 2), jnp.float32),
            ),
            grid=(n_cb, N, n_hwb),
            in_specs=[
                pl.BlockSpec((None, c_t, hw_t), lambda c, n, l: (n, c, l)),
                pl.BlockSpec((c_t, 1), lambda c, n, l: (c, 0)),
                pl.BlockSpec((c_t, 1), lambda c, n, l: (c, 0)),
                pl.BlockSpec((c_t, 1), lambda c, n, l: (c, 0)),
            ],
            out_specs=(
                pl.BlockSpec((c_t, 2), lambda c, n, l: (c, 0)),
                pl.BlockSpec((c_t, 2), lambda c, n, l: (c, 0)),
            ),
            scratch_shapes=[
                pltpu.VMEM((c_t, 1), jnp.float32),
                pltpu.VMEM((c_t, 1), jnp.float32),
            ],
            compiler_params=pltpu.CompilerParams(
                dimension_semantics=("parallel", "arbitrary", "arbitrary"),
                vmem_limit_bytes=vmem1,
            ),
        )(x3, rm2, w2, b2)

        # pass 2: normalize + affine + leaky_relu
        vmem2 = _vmem_limit(cfg, 4 * block_io + 2 * block_f32)
        y3 = pl.pallas_call(
            _make_norm_kernel(slope),
            out_shape=jax.ShapeDtypeStruct((N, C, HW), x_nchw.dtype),
            grid=(N, n_cb, n_hwb),
            in_specs=[
                pl.BlockSpec((None, c_t, hw_t), lambda n, c, l: (n, c, l)),
                pl.BlockSpec((c_t, 2), lambda n, c, l: (c, 0)),
            ],
            out_specs=pl.BlockSpec((None, c_t, hw_t), lambda n, c, l: (n, c, l)),
            compiler_params=pltpu.CompilerParams(
                dimension_semantics=("parallel", "parallel", "parallel"),
                vmem_limit_bytes=vmem2,
            ),
        )(x3, ss)

    y = y3.reshape(N, C, H, W)

    # Running-stat EMA (PyTorch uses the unbiased variance here).
    mean = mv[:, 0]
    var = mv[:, 1]
    if total > 1:
        var_unbiased = var * (float(total) / float(total - 1))
    else:
        var_unbiased = var
    new_rm = (1.0 - momentum) * running_mean + momentum * mean
    new_rv = (1.0 - momentum) * running_var + momentum * var_unbiased
    return y, new_rm, new_rv


# --------------------------------------------------------------------------
# pure-JAX reference (training-mode batch norm + leaky_relu)
# --------------------------------------------------------------------------
def reference_abn(x_nchw, weight, bias, eps=1e-5, slope=0.01):
    x = x_nchw.astype(jnp.float32)
    mean = jnp.mean(x, axis=(0, 2, 3), keepdims=True)
    var = jnp.mean((x - mean) ** 2, axis=(0, 2, 3), keepdims=True)
    xn = (x - mean) / jnp.sqrt(var + eps)
    y = xn * weight.reshape(1, -1, 1, 1) + bias.reshape(1, -1, 1, 1)
    return jnp.where(y >= 0, y, slope * y), mean[0, :, 0, 0], var[0, :, 0, 0]


if __name__ == "__main__":
    key = jax.random.PRNGKey(0)
    N, C, H, W = 2, 4, 16, 16
    x = jax.random.normal(key, (N, C, H, W), dtype=jnp.float32) * 2.0 + 0.5

    # deterministic init, matching ABN.reset_parameters()
    weight = jnp.ones((C,), dtype=jnp.float32)
    bias = jnp.zeros((C,), dtype=jnp.float32)
    running_mean = jnp.zeros((C,), dtype=jnp.float32)
    running_var = jnp.ones((C,), dtype=jnp.float32)

    eps, momentum, slope = 1e-5, 0.1, 0.01

    y_ref, mean_ref, var_ref = reference_abn(x, weight, bias, eps=eps, slope=slope)
    total = N * H * W
    rm_ref = (1.0 - momentum) * running_mean + momentum * mean_ref
    rv_ref = (1.0 - momentum) * running_var + momentum * var_ref * (total / (total - 1))

    # Exercise both the fused single-pass path and the streamed two-pass path.
    for fused in (True, False):
        y, new_rm, new_rv = abn_forward(x, weight, bias, running_mean,
                                        running_var, eps=eps,
                                        momentum=momentum, slope=slope,
                                        allow_fused=fused)
        jax.block_until_ready((y, new_rm, new_rv))
        assert y.shape == (N, C, H, W)
        assert jnp.max(jnp.abs(y - y_ref)) < 1e-4, "output mismatch vs reference"
        assert jnp.max(jnp.abs(new_rm - rm_ref)) < 1e-5, "running_mean mismatch"
        assert jnp.max(jnp.abs(new_rv - rv_ref)) < 1e-4, "running_var mismatch"

    print("KERNEL_OK")
</pallas_src>

<mosaic_0001>
module attributes {stable_mosaic.version = 11 : i64} {
  func.func @kernel(%arg0: i32, %arg1: memref<2x4x256xf32, #tpu.memory_space<vmem>>, %arg2: memref<4x1xf32, #tpu.memory_space<vmem>>, %arg3: memref<4x1xf32, #tpu.memory_space<vmem>>, %arg4: memref<2x4x256xf32, #tpu.memory_space<vmem>>, %arg5: memref<4x2xf32, #tpu.memory_space<vmem>>) attributes {dimension_semantics = [#tpu.dimension_semantics<parallel>], iteration_bounds = array<i64: 1>, scalar_prefetch = 0 : i64, scratch_operands = 0 : i64, tpu.core_type = #tpu.core_type<tc>, window_params = [{transform_indices = @transform_0, window_bounds = array<i64: 2, 4, 256>}, {transform_indices = @transform_1, window_bounds = array<i64: 4, 1>}, {transform_indices = @transform_2, window_bounds = array<i64: 4, 1>}, {transform_indices = @transform_3, window_bounds = array<i64: 2, 4, 256>}, {transform_indices = @transform_4, window_bounds = array<i64: 4, 2>}]} {
    %c0 = arith.constant 0 : index
    %c0_0 = arith.constant 0 : index
    %c0_1 = arith.constant 0 : index
    %0 = vector.load %arg1[%c0, %c0_0, %c0_1] : memref<2x4x256xf32, #tpu.memory_space<vmem>>, vector<2x4x256xf32>
    %cst = arith.constant dense<0.000000e+00> : vector<2x4xf32>
    %1 = vector.multi_reduction <add>, %0, %cst [2] : vector<2x4x256xf32> to vector<2x4xf32>
    %2 = vector.shape_cast %1 : vector<2x4xf32> to vector<2x4x1xf32>
    %cst_2 = arith.constant dense<0.000000e+00> : vector<4x1xf32>
    %3 = vector.multi_reduction <add>, %2, %cst_2 [0] : vector<2x4x1xf32> to vector<4x1xf32>
    %4 = vector.shape_cast %3 : vector<4x1xf32> to vector<1x4x1xf32>
    %5 = arith.mulf %0, %0 : vector<2x4x256xf32>
    %cst_3 = arith.constant dense<0.000000e+00> : vector<2x4xf32>
    %6 = vector.multi_reduction <add>, %5, %cst_3 [2] : vector<2x4x256xf32> to vector<2x4xf32>
    %7 = vector.shape_cast %6 : vector<2x4xf32> to vector<2x4x1xf32>
    %cst_4 = arith.constant dense<0.000000e+00> : vector<4x1xf32>
    %8 = vector.multi_reduction <add>, %7, %cst_4 [0] : vector<2x4x1xf32> to vector<4x1xf32>
    %9 = vector.shape_cast %8 : vector<4x1xf32> to vector<1x4x1xf32>
    %cst_5 = arith.constant 0.001953125 : f32
    %10 = vector.broadcast %cst_5 : f32 to vector<1x4x1xf32>
    %11 = arith.mulf %4, %10 : vector<1x4x1xf32>
    %cst_6 = arith.constant 0.001953125 : f32
    %12 = vector.broadcast %cst_6 : f32 to vector<1x4x1xf32>
    %13 = arith.mulf %9, %12 : vector<1x4x1xf32>
    %14 = arith.mulf %11, %11 : vector<1x4x1xf32>
    %15 = arith.subf %13, %14 : vector<1x4x1xf32>
    %cst_7 = arith.constant 0.000000e+00 : f32
    %16 = vector.broadcast %cst_7 : f32 to vector<1x4x1xf32>
    %17 = arith.maximumf %15, %16 : vector<1x4x1xf32>
    %cst_8 = arith.constant 9.99999974E-6 : f32
    %18 = vector.broadcast %cst_8 : f32 to vector<1x4x1xf32>
    %19 = arith.addf %17, %18 : vector<1x4x1xf32>
    %20 = math.rsqrt %19 : vector<1x4x1xf32>
    %c0_9 = arith.constant 0 : index
    %c0_10 = arith.constant 0 : index
    %21 = vector.load %arg2[%c0_9, %c0_10] : memref<4x1xf32, #tpu.memory_space<vmem>>, vector<4x1xf32>
    %c0_11 = arith.constant 0 : index
    %c0_12 = arith.constant 0 : index
    %22 = vector.load %arg3[%c0_11, %c0_12] : memref<4x1xf32, #tpu.memory_space<vmem>>, vector<4x1xf32>
    %23 = vector.shape_cast %21 : vector<4x1xf32> to vector<1x4x1xf32>
    %24 = arith.mulf %23, %20 : vector<1x4x1xf32>
    %25 = vector.shape_cast %22 : vector<4x1xf32> to vector<1x4x1xf32>
    %26 = arith.mulf %11, %24 : vector<1x4x1xf32>
    %27 = arith.subf %25, %26 : vector<1x4x1xf32>
    %28 = vector.broadcast %24 : vector<1x4x1xf32> to vector<2x4x256xf32>
    %29 = arith.mulf %0, %28 : vector<2x4x256xf32>
    %30 = vector.broadcast %27 : vector<1x4x1xf32> to vector<2x4x256xf32>
    %31 = arith.addf %29, %30 : vector<2x4x256xf32>
    %cst_13 = arith.constant 0.00999999977 : f32
    %32 = vector.broadcast %cst_13 : f32 to vector<2x4x256xf32>
    %33 = arith.mulf %31, %32 : vector<2x4x256xf32>
    %34 = arith.maximumf %31, %33 : vector<2x4x256xf32>
    %c0_14 = arith.constant 0 : index
    %c0_15 = arith.constant 0 : index
    %c0_16 = arith.constant 0 : index
    %35 = vector.load %arg4[%c0_14, %c0_15, %c0_16] : memref<2x4x256xf32, #tpu.memory_space<vmem>>, vector<2x4x256xf32>
    tpu.vector_store %arg4[%c0_14, %c0_15, %c0_16], %34 {strides = array<i32>} : memref<2x4x256xf32, #tpu.memory_space<vmem>>, vector<2x4x256xf32>,
    %36 = vector.shape_cast %11 : vector<1x4x1xf32> to vector<4x1xf32>
    %c0_17 = arith.constant 0 : index
    %c0_18 = arith.constant 0 : index
    %37 = vector.load %arg5[%c0_17, %c0_18] : memref<4x2xf32, #tpu.memory_space<vmem>>, vector<4x1xf32>
    tpu.vector_store %arg5[%c0_17, %c0_18], %36 {strides = array<i32>} : memref<4x2xf32, #tpu.memory_space<vmem>>, vector<4x1xf32>,
    %38 = vector.shape_cast %17 : vector<1x4x1xf32> to vector<4x1xf32>
    %c0_19 = arith.constant 0 : index
    %c1 = arith.constant 1 : index
    %39 = vector.load %arg5[%c0_19, %c1] : memref<4x2xf32, #tpu.memory_space<vmem>>, vector<4x1xf32>
    tpu.vector_store %arg5[%c0_19, %c1], %38 {strides = array<i32>} : memref<4x2xf32, #tpu.memory_space<vmem>>, vector<4x1xf32>,
    return
  }
  func.func @transform_0(%arg0: i32) -> (i32, i32, i32) {
    %c0_i32 = arith.constant 0 : i32
    %c0_i32_0 = arith.constant 0 : i32
    %c0_i32_1 = arith.constant 0 : i32
    return %c0_i32, %arg0, %c0_i32_0 : i32, i32, i32
  }
  func.func @transform_1(%arg0: i32) -> (i32, i32) {
    %c0_i32 = arith.constant 0 : i32
    %c0_i32_0 = arith.constant 0 : i32
    return %arg0, %c0_i32 : i32, i32
  }
  func.func @transform_2(%arg0: i32) -> (i32, i32) {
    %c0_i32 = arith.constant 0 : i32
    %c0_i32_0 = arith.constant 0 : i32
    return %arg0, %c0_i32 : i32, i32
  }
  func.func @transform_3(%arg0: i32) -> (i32, i32, i32) {
    %c0_i32 = arith.constant 0 : i32
    %c0_i32_0 = arith.constant 0 : i32
    %c0_i32_1 = arith.constant 0 : i32
    return %c0_i32, %arg0, %c0_i32_0 : i32, i32, i32
  }
  func.func @transform_4(%arg0: i32) -> (i32, i32) {
    %c0_i32 = arith.constant 0 : i32
    %c0_i32_0 = arith.constant 0 : i32
    return %arg0, %c0_i32 : i32, i32
  }
}

</mosaic_0001>

<bundles_post_ra>
// kernel: tpu_custom_call.1
= control target key start
LH: loop header
LB: loop body
LE: loop exit
PB: predicated region body
PF: predicated region fallthrough
CT: control target
= control target key end

     0   :  { %10 = vsyncpa [#allocation3], 0  ;;  %s306_s0 = inlined_call_operand.hbm [shape: f32[2,4,256], index: 0, kind: input, shape index: {}]   ;;  %s307_s1 = inlined_call_operand.vmem [shape: f32[4,1], index: 1, kind: input, shape index: {}]   ;;  %s308_s2 = inlined_call_operand.vmem [shape: f32[4,1], index: 2, kind: input, shape index: {}]   ;;  %s309_s3 = inlined_call_operand.hbm [shape: f32[2,4,256], index: 3, kind: output, shape index: {0}]   ;;  %s310_s4 = inlined_call_operand.vmem [shape: f32[4,2], index: 4, kind: output, shape index: {1}]  }
   0x1   :  { %11 = vsyncpa [#allocation4], 0  ;;  %s205_s15 = smov [#allocation2]   ;;  %s157_s19 = scalar_lea.hbm %s306_s0, 256 }
   0x2   :  { %s17_s16 = sshll.u32 %s205_s15, 4  ;;  %p158_p0 = scmp.ne.s32.totalorder %s306_s0, %s157_s19  ;;  %s18_s16 = int_to_ptr.vmem [resolvable:$true] %s17_s16 }
   0x3   :  { %p161_p1 = scmp.lt.u32.totalorder %s157_s19, %s306_s0 }
   0x5   :  { %p163_p2 = pnand %p161_p1, %p158_p0 }
   0x7   :  { %166 = shalt.err (!%p163_p2)
}
   0x8   :  { %s167_s24 = scalar_lea.vmem %s18_s16, 256  ;;  %p172_p4 = scmp.lt.s32.totalorder %s18_s16, %s18_s16 }
   0x9   :  { %p168_p3 = scmp.ne.s32.totalorder %s18_s16, %s167_s24  ;;  %p173_p5 = scmp.lt.s32.totalorder %s167_s24, %s167_s24 }
   0xb   :  { %p174_p6 = por %p173_p5, %p172_p4 }
   0xd   :  { %p175_p7 = pnand %p174_p6, %p168_p3 }
   0xf   :  { %178 = shalt.err (!%p175_p7)
}
  0x10   :  { %s206_s25 = smov 128   ;;  %s207_s26 = smov 8  }
  0x11   :  { %23 = dma.hbm_to_vmem [thread:$0]  %s306_s0, 256, %s18_s16, [#allocation3], %s206_s25, %s206_s25, %s207_s26  }
  0x12   :  { %201 = dma.done.wait [#allocation3], 256  }
  0x13   :  { %202 = vsyncadd [#allocation3], 4294967040  ;;  %vm39_vm0 = vcmask 1043456   ;;  %v251_v0 = vld [vmem:[#allocation2] sm:$0xff]  ;;  %v253_v1 = vld [vmem:[#allocation2 + $0x8] sm:$0xff]  ;;  %v208_v20 = vmov 0   ;;  %v93_v45 = vlaneseq }
  0x14   :  { %v35_v2 = vcombine.high %v251_v0, %v251_v0  ;;  %v40_v3 = vsel %vm39_vm0, %v251_v0, 0.0  ;;  %v53_v4 = vmul.f32 %v251_v0, %v251_v0  ;;  %v36_v5 = vcombine.high %v253_v1, %v253_v1  ;;  %151 = vset.pattern.permute.xlu0 %v208_v20  ;;  %152 = vset.pattern.permute.xlu1 %v208_v20  ;;  %v81_v37 = vld [vmem:[%s307_s1] sm:$0xf]  ;;  %s210_s1 = smov [#allocation5]  }
  0x15   :  { %v45_v6 = vsel %vm39_vm0, %v253_v1, 0.0  ;;  %v54_v7 = vmul.f32 %v253_v1, %v253_v1  ;;  %vm120_vm1 = vcmask 3072   ;;  %vm122_vm2 = vcmask 11272   ;;  %v82_v40 = vld [vmem:[%s308_s2] sm:$0xf]  ;;  %s129_s2 = sshll.u32 %s210_s1, 4  ;;  %s130_s2 = int_to_ptr.vmem [resolvable:$true] %s129_s2 }
  0x16   :  { %v41_v8 = vsel %vm39_vm0, %v35_v2, 0.0  ;;  %v57_v9 = vcombine.high %v53_v4, %v53_v4  ;;  %v61_v10 = vsel %vm39_vm0, %v53_v4, 0.0  ;;  %v46_v11 = vsel %vm39_vm0, %v36_v5, 0.0  ;;  %p184_p9 = scmp.lt.s32.totalorder %s130_s2, %s130_s2 }
  0x17   :  { %v42_v12 = vadd.f32 %v41_v8, %v40_v3  ;;  %v58_v13 = vcombine.high %v54_v7, %v54_v7  ;;  %v66_v15 = vsel %vm39_vm0, %v54_v7, 0.0  ;;  %v47_v17 = vadd.f32 %v46_v11, %v45_v6 }
  0x18   :  { %v62_v14 = vsel %vm39_vm0, %v57_v9, 0.0  ;;  %v209_v43 = vmov 839922192   ;;  %v94_v47 = vshrl.u32 %v93_v45, 7 }
  0x19   :  { %43 = vadd.xlane.f32.xlu0 %v42_v12  ;;  %v63_v16 = vadd.f32 %v62_v14, %v61_v10  ;;  %v67_v18 = vsel %vm39_vm0, %v58_v13, 0.0  ;;  %v91_v44 = vunpack.c.l.s4 %v209_v43 }
  0x1a   :  { %v68_v19 = vadd.f32 %v67_v18, %v66_v15 }
  0x1b   :  { %64 = vadd.xlane.f32.xlu1 %v63_v16  ;;  %v92_v46 = vunpack.c.0.s8 %v91_v44 }
  0x1d   :  { %48 = vadd.xlane.f32.xlu0 %v47_v17  ;;  %v95_v48 = vsub.s32 %v92_v46, %v94_v47 }
  0x1f   :  { %69 = vadd.xlane.f32.xlu1 %v68_v19 }
  0xa6   :  { %v44_v21 = vpop.xlane.xlu0 %43 }
  0xa7   :  { %v50_v24 = vsel %vm39_vm0, %v44_v21, 0.0 }
  0xa8   :  { %v65_v22 = vpop.xlane.xlu1 %64 }
  0xa9   :  { %v71_v28 = vsel %vm39_vm0, %v65_v22, 0.0 }
  0xaa   :  { %v49_v23 = vpop.xlane.xlu0 %48 }
  0xab   :  { %v51_v25 = vsel %vm39_vm0, %v49_v23, 0.0 }
  0xac   :  { %v52_v26 = vadd.f32 %v51_v25, %v50_v24  ;;  %v70_v27 = vpop.xlane.xlu1 %69 }
  0xad   :  { %v72_v29 = vsel %vm39_vm0, %v70_v27, 0.0 }
  0xae   :  { %v74_v30 = vmul.f32 0.001953125, %v52_v26  ;;  %v73_v31 = vadd.f32 %v72_v29, %v71_v28 }
  0xb0   :  { %121 = vst.msk [vmem:[%s310_s4] sm:$0xf] %vm120_vm1, %v74_v30  ;;  %v75_v32 = vmul.f32 0.001953125, %v73_v31  ;;  %v76_v33 = vmul.f32 %v74_v30, %v74_v30 }
  0xb2   :  { %v77_v34 = vsub.f32 %v75_v32, %v76_v33 }
  0xb4   :  { %v78_v35 = vmax.f32 %v77_v34, 0.0 }
  0xb6   :  { %v79_v36 = vadd.f32 1e-05, %v78_v35  ;;  %123 = vst.msk [vmem:[%s310_s4] sm:$0xf] %vm122_vm2, %v78_v35  ;;  %s179_s4 = scalar_lea.vmem %s130_s2, 256 }
  0xb7   :  { %p180_p8 = scmp.ne.s32.totalorder %s130_s2, %s179_s4  ;;  %p185_p10 = scmp.lt.s32.totalorder %s179_s4, %s179_s4 }
  0xb8   :  { %155 = vrsqrt.f32 %v79_v36 }
  0xb9   :  { %p186_p11 = por %p185_p10, %p184_p9 }
  0xbb   :  { %p187_p12 = pnand %p186_p11, %p180_p8 }
  0xc2   :  { %v156_v38 = vpop.eup %155 }
  0xc3   :  { %v83_v39 = vmul.f32 %v156_v38, %v81_v37 }
  0xc5   :  { %88 = vperm.xlu0 %151, %v83_v39   ;;  %v84_v41 = vmul.f32 %v83_v39, %v74_v30 }
  0xc7   :  { %v85_v42 = vsub.f32 %v82_v40, %v84_v41 }
  0xc9   :  { %102 = vperm.xlu1 %152, %v85_v42  }
 0x144   :  { %v89_v49 = vpop.permute.xlu0 %88 }
 0x145   :  { %v96_v50 = vrot.slane %v89_v49, %v95_v48 }
 0x147   :  { %v98_v52 = vmul.f32 %v96_v50, %v251_v0  ;;  %v99_v53 = vmul.f32 %v96_v50, %v253_v1 }
 0x148   :  { %v103_v51 = vpop.permute.xlu1 %102 }
 0x149   :  { %v110_v54 = vrot.slane %v103_v51, %v95_v48 }
 0x14b   :  { %v112_v55 = vadd.f32 %v110_v54, %v98_v52  ;;  %v113_v56 = vadd.f32 %v110_v54, %v99_v53 }
 0x14d   :  { %v114_v57 = vmul.f32 0.01, %v112_v55  ;;  %v115_v58 = vmul.f32 0.01, %v113_v56 }
 0x14f   :  { %v116_v59 = vmax.f32 %v112_v55, %v114_v57  ;;  %v117_v60 = vmax.f32 %v113_v56, %v115_v58 }
 0x151   :  { %118 = vst [vmem:[#allocation5] sm:$0xff] %v116_v59  ;;  %119 = vst [vmem:[#allocation5 + $0x8] sm:$0xff] %v117_v60 }
 0x152   :  { %190 = shalt.err (!%p187_p12)
}
 0x153   :  { %s191_s12 = scalar_lea.hbm %s309_s3, 256 }
 0x154   :  { %p192_p13 = scmp.ne.s32.totalorder %s309_s3, %s191_s12  ;;  %p195_p0 = scmp.lt.u32.totalorder %s191_s12, %s309_s3 }
 0x156   :  { %p197_p1 = pnand %p195_p0, %p192_p13 }
 0x158   :  { %200 = shalt.err (!%p197_p1)
}
 0x159   :  { %135 = dma.vmem_to_hbm [thread:$0]  %s130_s2, 256, %s309_s3, [#allocation4], %s206_s25, %s206_s25, %s207_s26  }
 0x15a   :  { %203 = dma.done.wait [#allocation4], 256  }
 0x15b   :  { %204 = vsyncadd [#allocation4], 4294967040 }
 0x15c   :  { %143 = vsyncpa [#allocation3], 1 }
 0x15d   :  { %144 = vsyncpa [#allocation4], 1 }

</bundles_post_ra>
